<compile_context>
chip_gen: v5e
topology: v5e:2x2
jax: 0.10.0
libtpu: 0.0.40
codegen_flags: <defaults>
</compile_context>

<pallas_src>
import functools

import jax
import jax.numpy as jnp
from jax.experimental import pallas as pl
from jax.experimental.pallas import tpu as pltpu


def _round_up(x, m):
    return ((x + m - 1) // m) * m


def _round_down8(x):
    return max(8, (x // 8) * 8)


def _mlp2(x, w1, t1, w2, b2):
    """Linear -> (folded BN + bias) -> ReLU -> Linear on a 2-D (M, D) slab.

    MXU operands keep the dtype they were handed on the host (f32 or bf16);
    accumulation and all elementwise work are f32.
    """
    h = jnp.dot(x, w1, preferred_element_type=jnp.float32)
    h = jnp.maximum(h + t1, 0.0)
    out = jnp.dot(h.astype(w2.dtype), w2, preferred_element_type=jnp.float32)
    return out + b2


def cg_block_kernel(s_ref, c_ref,
                    ws1_ref, ts1_ref, ws2_ref, bs2_ref,
                    wc1_ref, tc1_ref, wc2_ref, bc2_ref,
                    s_out_ref, agg_ref, *, n, n_valid, pooling):
    tb = c_ref.shape[0]
    d_out_p = agg_ref.shape[-1]

    # ---- c branch: c_mlp(c)  (TB, d_in) -> (TB, d_out_p) ----
    c_out = _mlp2(c_ref[...], wc1_ref[...], tc1_ref[...],
                  wc2_ref[...], bc2_ref[...])

    # ---- s branch: one large-M matmul over the collapsed (TB*n) axis ----
    s_o = _mlp2(s_ref[...], ws1_ref[...], ts1_ref[...],
                ws2_ref[...], bs2_ref[...])

    # gating: s_i * c (broadcast c over the set dim); n is sublane-aligned and
    # d_out_p is lane-aligned, so the reshape is layout-preserving.
    s3 = s_o.reshape(tb, n, d_out_p) * c_out[:, None, :]
    s_out_ref[...] = s3.reshape(tb * n, d_out_p).astype(s_out_ref.dtype)

    # pooling over the (possibly zero-padded) set dimension
    if pooling == 'max':
        if n_valid != n:
            set_idx = jax.lax.broadcasted_iota(jnp.int32, s3.shape, 1)
            s3 = jnp.where(set_idx < n_valid, s3, -jnp.inf)
        agg = jnp.max(s3, axis=1)
    else:  # 'mean'
        if n_valid != n:
            set_idx = jax.lax.broadcasted_iota(jnp.int32, s3.shape, 1)
            s3 = jnp.where(set_idx < n_valid, s3, 0.0)
        agg = jnp.sum(s3, axis=1) * (1.0 / n_valid)
    agg_ref[...] = agg.astype(agg_ref.dtype)


def _fold_and_pad_params(p, d_h_p, d_out_p, mxu_dtype):
    """Fold Linear bias + eval-mode BN into the first layer and zero-pad the
    hidden / output feature dims to lane-aligned widths.

    ((x @ w1 + b1) * g1 + t1)  ==  x @ (w1 * g1) + (b1 * g1 + t1)
    """
    w1f = p['w1'] * p['g1']
    t1f = p['b1'] * p['g1'] + p['t1']
    d_in, d_h = w1f.shape
    d_out = p['w2'].shape[1]
    w1p = jnp.zeros((d_in, d_h_p), jnp.float32).at[:, :d_h].set(w1f)
    t1p = jnp.zeros((1, d_h_p), jnp.float32).at[:, :d_h].set(t1f)
    w2p = jnp.zeros((d_h_p, d_out_p), jnp.float32).at[:d_h, :d_out].set(p['w2'])
    b2p = jnp.zeros((1, d_out_p), jnp.float32).at[:, :d_out].set(p['b2'])
    # MXU operands cast once on the host; bias/shift terms stay f32 (VPU adds).
    return w1p.astype(mxu_dtype), t1p, w2p.astype(mxu_dtype), b2p


def cg_block(pooling, s, c, s_params, c_params, *,
             tile_b=None, mxu_dtype=jnp.float32):
    """Pallas implementation of CGBlock.forward(pooling, s, c)."""
    if pooling not in ('max', 'mean'):
        raise Exception('Unknown pooling mode for CG')
    assert s.ndim == 3 and c.ndim == 2
    B, N, d_in = s.shape
    d_h = s_params['w1'].shape[1]
    d_out = s_params['w2'].shape[1]
    d_h_p = _round_up(d_h, 128)      # lane-dense hidden activations
    d_out_p = _round_up(d_out, 128)  # lane-dense (unmasked) output stores
    n_pad = _round_up(N, 8)          # sublane-aligned set axis

    ws1, ts1, ws2, bs2 = _fold_and_pad_params(s_params, d_h_p, d_out_p, mxu_dtype)
    wc1, tc1, wc2, bc2 = _fold_and_pad_params(c_params, d_h_p, d_out_p, mxu_dtype)
    residents = (ws1, ts1, ws2, bs2, wc1, tc1, wc2, bc2)
    resident_bytes = sum(int(a.size) * a.dtype.itemsize for a in residents)

    if n_pad != N:
        s = jnp.pad(s, ((0, 0), (0, n_pad - N), (0, 0)))
    # Collapse (B, N) -> B*N rows; cast MXU inputs once on the host (not per step).
    s_flat = s.reshape(B * n_pad, d_in).astype(mxu_dtype)
    c_in = c.astype(mxu_dtype)
    in_sz = jnp.dtype(mxu_dtype).itemsize

    # --- per-batch-row VMEM accounting (double-buffered tiles + f32 temps) ---
    per_b = (n_pad * (2 * d_in * in_sz        # s tile (x2 buffers)
                      + 2 * d_out_p * 4       # s_out tile (x2 buffers)
                      + 4 * d_h_p             # f32 hidden slab
                      + 4 * d_out_p)          # gated f32 temporary
             + 2 * d_in * in_sz               # c tile (x2 buffers)
             + 2 * d_out_p * 4                # agg tile (x2 buffers)
             + 4 * d_h_p)                     # c-branch hidden

    try:
        vmem_cap = int(pltpu.get_tpu_info().vmem_capacity_bytes)
    except Exception:
        vmem_cap = 64 << 20                   # v7x per-core physical VMEM
    budget = vmem_cap // 3                    # per-step tile budget

    if tile_b is None:
        tile_b = int(max(1, (budget - 2 * resident_bytes) // max(per_b, 1)))
        tile_b = min(tile_b, B)
        if B >= 16:
            # >= 2 grid steps so ("parallel",) spreads work over both TCs (v7x).
            tile_b = min(tile_b, _round_down8(pl.cdiv(B, 2)))
        if tile_b != B:
            tile_b = min(B, _round_down8(tile_b))   # sublane alignment
    else:
        tile_b = min(int(tile_b), B)
        if tile_b != B and tile_b % 8 != 0:
            raise ValueError("tile_b must be a multiple of 8 or equal the batch")

    grid = (pl.cdiv(B, tile_b),)
    row_blk = tile_b * n_pad

    vmem_limit = int(min(vmem_cap,
                         max(32 << 20,
                             per_b * tile_b + 2 * resident_bytes + (4 << 20))))

    def _resident_spec(a, single_buffer):
        idx = lambda i, _nd=a.ndim: (0,) * _nd
        if single_buffer:
            try:
                # Constant index_map -> one buffer is enough; halves resident VMEM.
                return pl.BlockSpec(a.shape, idx, pipeline_mode=pl.Buffered(1))
            except Exception:
                pass
        return pl.BlockSpec(a.shape, idx)

    flops = 2 * (B * n_pad + B) * (d_in * d_h_p + d_h_p * d_out_p)
    bytes_accessed = (B * n_pad * (d_in * in_sz + d_out_p * 4)
                      + B * (d_in * in_sz + d_out_p * 4) + resident_bytes)
    cost = pl.CostEstimate(flops=flops, transcendentals=0,
                           bytes_accessed=bytes_accessed)

    kernel = functools.partial(cg_block_kernel, n=n_pad, n_valid=N,
                               pooling=pooling)

    def _run(single_buffer):
        in_specs = [
            pl.BlockSpec((row_blk, d_in), lambda i: (i, 0)),   # s tile
            pl.BlockSpec((tile_b, d_in), lambda i: (i, 0)),    # c tile
        ] + [_resident_spec(a, single_buffer) for a in residents]
        out_specs = (
            pl.BlockSpec((row_blk, d_out_p), lambda i: (i, 0)),  # s_out tile
            pl.BlockSpec((tile_b, d_out_p), lambda i: (i, 0)),   # agg tile
        )
        return pl.pallas_call(
            kernel,
            out_shape=(jax.ShapeDtypeStruct((B * n_pad, d_out_p), jnp.float32),
                       jax.ShapeDtypeStruct((B, d_out_p), jnp.float32)),
            grid=grid,
            in_specs=in_specs,
            out_specs=out_specs,
            compiler_params=pltpu.CompilerParams(
                dimension_semantics=("parallel",),
                vmem_limit_bytes=vmem_limit),
            cost_estimate=cost,
        )(s_flat, c_in, *residents)

    try:
        s_out_flat, agg_p = _run(single_buffer=True)
    except Exception:
        # Fallback for JAX/Mosaic versions without single-buffered operands.
        s_out_flat, agg_p = _run(single_buffer=False)

    s_out = s_out_flat.reshape(B, n_pad, d_out_p)[:, :N, :d_out]
    aggregated_c = agg_p[:, :d_out]
    return s_out, aggregated_c


def init_mlp_params(key, dims):
    """Deterministic params for a 2-layer MLP (Linear->BN->ReLU->Linear).

    BatchNorm1d eval-mode stats are folded into per-feature (g, t).
    Weights are stored already transposed for x @ W.
    """
    d_in, d_h, d_out = dims
    k = jax.random.split(key, 8)
    eps = 1e-5
    w1 = jax.random.normal(k[0], (d_in, d_h), jnp.float32) * 0.2
    b1 = jax.random.normal(k[1], (1, d_h), jnp.float32) * 0.1
    gamma = jax.random.uniform(k[2], (1, d_h), jnp.float32, 0.5, 1.5)
    beta = jax.random.normal(k[3], (1, d_h), jnp.float32) * 0.1
    r_mean = jax.random.normal(k[4], (1, d_h), jnp.float32) * 0.1
    r_var = jax.random.uniform(k[5], (1, d_h), jnp.float32, 0.5, 1.5)
    g1 = gamma / jnp.sqrt(r_var + eps)
    t1 = beta - r_mean * g1
    w2 = jax.random.normal(k[6], (d_h, d_out), jnp.float32) * 0.2
    b2 = jax.random.normal(k[7], (1, d_out), jnp.float32) * 0.1
    return dict(w1=w1, b1=b1, g1=g1, t1=t1, w2=w2, b2=b2)


def cg_block_reference(pooling, s, c, sp, cp):
    """Pure-JAX reference mirroring the PyTorch loop (un-folded params)."""
    def mlp(x, p):
        h = x @ p['w1'] + p['b1']
        h = jnp.maximum(h * p['g1'] + p['t1'], 0.0)
        return h @ p['w2'] + p['b2']

    c_out = mlp(c, cp)
    s_list = [mlp(s[:, i, :], sp) * c_out for i in range(s.shape[1])]
    s_out = jnp.stack(s_list, axis=1)
    if pooling == 'max':
        agg = jnp.max(s_out, axis=1)
    else:
        agg = jnp.mean(s_out, axis=1)
    return s_out, agg


if __name__ == "__main__":
    key = jax.random.PRNGKey(0)
    k_s, k_c, k_sp, k_cp = jax.random.split(key, 4)

    mlp_layer_dim = [16, 32, 32]    # num_mlp_layers = 2
    s_params = init_mlp_params(k_sp, mlp_layer_dim)
    c_params = init_mlp_params(k_cp, mlp_layer_dim)

    # (B, N, tile_b, mxu_dtype, atol, rtol)
    configs = [
        (2, 8, None, jnp.float32, 1e-4, 1e-4),     # tiny, single grid step
        (16, 8, 8, jnp.float32, 1e-4, 1e-4),       # multi-step pipelined grid
        (8, 8, None, jnp.float32, 1e-4, 1e-4),     # auto tile_b
        (4, 6, None, jnp.float32, 1e-4, 1e-4),     # N % 8 != 0 -> padded set axis
        (16, 8, None, jnp.bfloat16, 1.5e-1, 5e-2), # bf16 MXU operands, f32 accum
    ]

    ok = True
    for B, N, tile_b, mxu_dtype, atol, rtol in configs:
        s = jax.random.normal(k_s, (B, N, mlp_layer_dim[0]), jnp.float32)
        c = jax.random.normal(k_c, (B, mlp_layer_dim[0]), jnp.float32)
        for pooling in ('max', 'mean'):
            s_out, agg = cg_block(pooling, s, c, s_params, c_params,
                                  tile_b=tile_b, mxu_dtype=mxu_dtype)
            s_out = jax.block_until_ready(s_out)
            agg = jax.block_until_ready(agg)
            s_ref, agg_ref = cg_block_reference(pooling, s, c,
                                                s_params, c_params)
            ok &= bool(jnp.allclose(s_out, s_ref, atol=atol, rtol=rtol))
            ok &= bool(jnp.allclose(agg, agg_ref, atol=atol, rtol=rtol))
            assert s_out.shape == (B, N, mlp_layer_dim[-1])
            assert agg.shape == (B, mlp_layer_dim[-1])

    if ok:
        print("KERNEL_OK")
    else:
        print("KERNEL_MISMATCH")
</pallas_src>

<mosaic_0001>
module attributes {stable_mosaic.version = 11 : i64} {
  func.func @cg_block_kernel(%arg0: i32, %arg1: memref<16x16xf32, #tpu.memory_space<vmem>>, %arg2: memref<2x16xf32, #tpu.memory_space<vmem>>, %arg3: memref<16x128xf32, #tpu.memory_space<vmem>>, %arg4: memref<1x128xf32, #tpu.memory_space<vmem>>, %arg5: memref<128x128xf32, #tpu.memory_space<vmem>>, %arg6: memref<1x128xf32, #tpu.memory_space<vmem>>, %arg7: memref<16x128xf32, #tpu.memory_space<vmem>>, %arg8: memref<1x128xf32, #tpu.memory_space<vmem>>, %arg9: memref<128x128xf32, #tpu.memory_space<vmem>>, %arg10: memref<1x128xf32, #tpu.memory_space<vmem>>, %arg11: memref<16x128xf32, #tpu.memory_space<vmem>>, %arg12: memref<2x128xf32, #tpu.memory_space<vmem>>) attributes {dimension_semantics = [#tpu.dimension_semantics<parallel>], iteration_bounds = array<i64: 1>, scalar_prefetch = 0 : i64, scratch_operands = 0 : i64, tpu.core_type = #tpu.core_type<tc>, window_params = [{transform_indices = @transform_0, window_bounds = array<i64: 16, 16>}, {transform_indices = @transform_1, window_bounds = array<i64: 2, 16>}, {pipeline_mode = #tpu.pipeline_mode<synchronous>, transform_indices = @transform_2, window_bounds = array<i64: 16, 128>}, {pipeline_mode = #tpu.pipeline_mode<synchronous>, transform_indices = @transform_3, window_bounds = array<i64: 1, 128>}, {pipeline_mode = #tpu.pipeline_mode<synchronous>, transform_indices = @transform_4, window_bounds = array<i64: 128, 128>}, {pipeline_mode = #tpu.pipeline_mode<synchronous>, transform_indices = @transform_5, window_bounds = array<i64: 1, 128>}, {pipeline_mode = #tpu.pipeline_mode<synchronous>, transform_indices = @transform_6, window_bounds = array<i64: 16, 128>}, {pipeline_mode = #tpu.pipeline_mode<synchronous>, transform_indices = @transform_7, window_bounds = array<i64: 1, 128>}, {pipeline_mode = #tpu.pipeline_mode<synchronous>, transform_indices = @transform_8, window_bounds = array<i64: 128, 128>}, {pipeline_mode = #tpu.pipeline_mode<synchronous>, transform_indices = @transform_9, window_bounds = array<i64: 1, 128>}, {transform_indices = @transform_10, window_bounds = array<i64: 16, 128>}, {transform_indices = @transform_11, window_bounds = array<i64: 2, 128>}]} {
    %c0 = arith.constant 0 : index
    %c0_0 = arith.constant 0 : index
    %0 = vector.load %arg2[%c0, %c0_0] : memref<2x16xf32, #tpu.memory_space<vmem>>, vector<2x16xf32>
    %c0_1 = arith.constant 0 : index
    %c0_2 = arith.constant 0 : index
    %1 = vector.load %arg7[%c0_1, %c0_2] : memref<16x128xf32, #tpu.memory_space<vmem>>, vector<16x128xf32>
    %c0_3 = arith.constant 0 : index
    %c0_4 = arith.constant 0 : index
    %2 = vector.load %arg8[%c0_3, %c0_4] : memref<1x128xf32, #tpu.memory_space<vmem>>, vector<1x128xf32>
    %c0_5 = arith.constant 0 : index
    %c0_6 = arith.constant 0 : index
    %3 = vector.load %arg9[%c0_5, %c0_6] : memref<128x128xf32, #tpu.memory_space<vmem>>, vector<128x128xf32>
    %c0_7 = arith.constant 0 : index
    %c0_8 = arith.constant 0 : index
    %4 = vector.load %arg10[%c0_7, %c0_8] : memref<1x128xf32, #tpu.memory_space<vmem>>, vector<1x128xf32>
    %cst = arith.constant dense<0.000000e+00> : vector<2x128xf32>
    %5 = tpu.matmul %0, %1, %cst {dimension_numbers = #tpu.dot_dimension_numbers<[1], [0], [0], [1], [0, 0, 1, 1], [], []>} : vector<2x16xf32>, vector<16x128xf32>, vector<2x128xf32> -> vector<2x128xf32>
    %6 = vector.broadcast %2 : vector<1x128xf32> to vector<2x128xf32>
    %7 = arith.addf %5, %6 : vector<2x128xf32>
    %cst_9 = arith.constant 0.000000e+00 : f32
    %8 = vector.broadcast %cst_9 : f32 to vector<2x128xf32>
    %9 = arith.maximumf %7, %8 : vector<2x128xf32>
    %cst_10 = arith.constant dense<0.000000e+00> : vector<2x128xf32>
    %10 = tpu.matmul %9, %3, %cst_10 {dimension_numbers = #tpu.dot_dimension_numbers<[1], [0], [0], [1], [0, 0, 1, 1], [], []>} : vector<2x128xf32>, vector<128x128xf32>, vector<2x128xf32> -> vector<2x128xf32>
    %11 = vector.broadcast %4 : vector<1x128xf32> to vector<2x128xf32>
    %12 = arith.addf %10, %11 : vector<2x128xf32>
    %c0_11 = arith.constant 0 : index
    %c0_12 = arith.constant 0 : index
    %13 = vector.load %arg1[%c0_11, %c0_12] : memref<16x16xf32, #tpu.memory_space<vmem>>, vector<16x16xf32>
    %c0_13 = arith.constant 0 : index
    %c0_14 = arith.constant 0 : index
    %14 = vector.load %arg3[%c0_13, %c0_14] : memref<16x128xf32, #tpu.memory_space<vmem>>, vector<16x128xf32>
    %c0_15 = arith.constant 0 : index
    %c0_16 = arith.constant 0 : index
    %15 = vector.load %arg4[%c0_15, %c0_16] : memref<1x128xf32, #tpu.memory_space<vmem>>, vector<1x128xf32>
    %c0_17 = arith.constant 0 : index
    %c0_18 = arith.constant 0 : index
    %16 = vector.load %arg5[%c0_17, %c0_18] : memref<128x128xf32, #tpu.memory_space<vmem>>, vector<128x128xf32>
    %c0_19 = arith.constant 0 : index
    %c0_20 = arith.constant 0 : index
    %17 = vector.load %arg6[%c0_19, %c0_20] : memref<1x128xf32, #tpu.memory_space<vmem>>, vector<1x128xf32>
    %cst_21 = arith.constant dense<0.000000e+00> : vector<16x128xf32>
    %18 = tpu.matmul %13, %14, %cst_21 {dimension_numbers = #tpu.dot_dimension_numbers<[1], [0], [0], [1], [0, 0, 1, 1], [], []>} : vector<16x16xf32>, vector<16x128xf32>, vector<16x128xf32> -> vector<16x128xf32>
    %19 = vector.broadcast %15 : vector<1x128xf32> to vector<16x128xf32>
    %20 = arith.addf %18, %19 : vector<16x128xf32>
    %cst_22 = arith.constant 0.000000e+00 : f32
    %21 = vector.broadcast %cst_22 : f32 to vector<16x128xf32>
    %22 = arith.maximumf %20, %21 : vector<16x128xf32>
    %cst_23 = arith.constant dense<0.000000e+00> : vector<16x128xf32>
    %23 = tpu.matmul %22, %16, %cst_23 {dimension_numbers = #tpu.dot_dimension_numbers<[1], [0], [0], [1], [0, 0, 1, 1], [], []>} : vector<16x128xf32>, vector<128x128xf32>, vector<16x128xf32> -> vector<16x128xf32>
    %24 = vector.broadcast %17 : vector<1x128xf32> to vector<16x128xf32>
    %25 = arith.addf %23, %24 : vector<16x128xf32>
    %26 = vector.shape_cast %25 : vector<16x128xf32> to vector<2x8x128xf32>
    %27 = vector.shape_cast %12 : vector<2x128xf32> to vector<2x1x128xf32>
    %28 = vector.broadcast %27 : vector<2x1x128xf32> to vector<2x8x128xf32>
    %29 = arith.mulf %26, %28 : vector<2x8x128xf32>
    %30 = vector.shape_cast %29 : vector<2x8x128xf32> to vector<16x128xf32>
    %c0_24 = arith.constant 0 : index
    %c0_25 = arith.constant 0 : index
    %31 = vector.load %arg11[%c0_24, %c0_25] : memref<16x128xf32, #tpu.memory_space<vmem>>, vector<16x128xf32>
    tpu.vector_store %arg11[%c0_24, %c0_25], %30 {strides = array<i32>} : memref<16x128xf32, #tpu.memory_space<vmem>>, vector<16x128xf32>,
    %cst_26 = arith.constant dense<0xFF800000> : vector<2x128xf32>
    %32 = vector.multi_reduction <maximumf>, %29, %cst_26 [1] : vector<2x8x128xf32> to vector<2x128xf32>
    %c0_27 = arith.constant 0 : index
    %c0_28 = arith.constant 0 : index
    %33 = vector.load %arg12[%c0_27, %c0_28] : memref<2x128xf32, #tpu.memory_space<vmem>>, vector<2x128xf32>
    tpu.vector_store %arg12[%c0_27, %c0_28], %32 {strides = array<i32>} : memref<2x128xf32, #tpu.memory_space<vmem>>, vector<2x128xf32>,
    return
  }
  func.func @transform_0(%arg0: i32) -> (i32, i32) {
    %c0_i32 = arith.constant 0 : i32
    %c0_i32_0 = arith.constant 0 : i32
    return %arg0, %c0_i32 : i32, i32
  }
  func.func @transform_1(%arg0: i32) -> (i32, i32) {
    %c0_i32 = arith.constant 0 : i32
    %c0_i32_0 = arith.constant 0 : i32
    return %arg0, %c0_i32 : i32, i32
  }
  func.func @transform_2(%arg0: i32) -> (i32, i32) {
    %c0_i32 = arith.constant 0 : i32
    %c0_i32_0 = arith.constant 0 : i32
    %c0_i32_1 = arith.constant 0 : i32
    return %c0_i32, %c0_i32_0 : i32, i32
  }
  func.func @transform_3(%arg0: i32) -> (i32, i32) {
    %c0_i32 = arith.constant 0 : i32
    %c0_i32_0 = arith.constant 0 : i32
    %c0_i32_1 = arith.constant 0 : i32
    return %c0_i32, %c0_i32_0 : i32, i32
  }
  func.func @transform_4(%arg0: i32) -> (i32, i32) {
    %c0_i32 = arith.constant 0 : i32
    %c0_i32_0 = arith.constant 0 : i32
    %c0_i32_1 = arith.constant 0 : i32
    return %c0_i32, %c0_i32_0 : i32, i32
  }
  func.func @transform_5(%arg0: i32) -> (i32, i32) {
    %c0_i32 = arith.constant 0 : i32
    %c0_i32_0 = arith.constant 0 : i32
    %c0_i32_1 = arith.constant 0 : i32
    return %c0_i32, %c0_i32_0 : i32, i32
  }
  func.func @transform_6(%arg0: i32) -> (i32, i32) {
    %c0_i32 = arith.constant 0 : i32
    %c0_i32_0 = arith.constant 0 : i32
    %c0_i32_1 = arith.constant 0 : i32
    return %c0_i32, %c0_i32_0 : i32, i32
  }
  func.func @transform_7(%arg0: i32) -> (i32, i32) {
    %c0_i32 = arith.constant 0 : i32
    %c0_i32_0 = arith.constant 0 : i32
    %c0_i32_1 = arith.constant 0 : i32
    return %c0_i32, %c0_i32_0 : i32, i32
  }
  func.func @transform_8(%arg0: i32) -> (i32, i32) {
    %c0_i32 = arith.constant 0 : i32
    %c0_i32_0 = arith.constant 0 : i32
    %c0_i32_1 = arith.constant 0 : i32
    return %c0_i32, %c0_i32_0 : i32, i32
  }
  func.func @transform_9(%arg0: i32) -> (i32, i32) {
    %c0_i32 = arith.constant 0 : i32
    %c0_i32_0 = arith.constant 0 : i32
    %c0_i32_1 = arith.constant 0 : i32
    return %c0_i32, %c0_i32_0 : i32, i32
  }
  func.func @transform_10(%arg0: i32) -> (i32, i32) {
    %c0_i32 = arith.constant 0 : i32
    %c0_i32_0 = arith.constant 0 : i32
    return %arg0, %c0_i32 : i32, i32
  }
  func.func @transform_11(%arg0: i32) -> (i32, i32) {
    %c0_i32 = arith.constant 0 : i32
    %c0_i32_0 = arith.constant 0 : i32
    return %arg0, %c0_i32 : i32, i32
  }
}

module attributes {stable_mosaic.version = 11 : i64} {
  func.func @cg_block_kernel(%arg0: i32, %arg1: memref<16x16xf32, #tpu.memory_space<vmem>>, %arg2: memref<2x16xf32, #tpu.memory_space<vmem>>, %arg3: memref<16x128xf32, #tpu.memory_space<vmem>>, %arg4: memref<1x128xf32, #tpu.memory_space<vmem>>, %arg5: memref<128x128xf32, #tpu.memory_space<vmem>>, %arg6: memref<1x128xf32, #tpu.memory_space<vmem>>, %arg7: memref<16x128xf32, #tpu.memory_space<vmem>>, %arg8: memref<1x128xf32, #tpu.memory_space<vmem>>, %arg9: memref<128x128xf32, #tpu.memory_space<vmem>>, %arg10: memref<1x128xf32, #tpu.memory_space<vmem>>, %arg11: memref<16x128xf32, #tpu.memory_space<vmem>>, %arg12: memref<2x128xf32, #tpu.memory_space<vmem>>) attributes {dimension_semantics = [#tpu.dimension_semantics<parallel>], iteration_bounds = array<i64: 1>, scalar_prefetch = 0 : i64, scratch_operands = 0 : i64, tpu.core_type = #tpu.core_type<tc>, window_params = [{transform_indices = @transform_0, window_bounds = array<i64: 16, 16>}, {transform_indices = @transform_1, window_bounds = array<i64: 2, 16>}, {pipeline_mode = #tpu.pipeline_mode<synchronous>, transform_indices = @transform_2, window_bounds = array<i64: 16, 128>}, {pipeline_mode = #tpu.pipeline_mode<synchronous>, transform_indices = @transform_3, window_bounds = array<i64: 1, 128>}, {pipeline_mode = #tpu.pipeline_mode<synchronous>, transform_indices = @transform_4, window_bounds = array<i64: 128, 128>}, {pipeline_mode = #tpu.pipeline_mode<synchronous>, transform_indices = @transform_5, window_bounds = array<i64: 1, 128>}, {pipeline_mode = #tpu.pipeline_mode<synchronous>, transform_indices = @transform_6, window_bounds = array<i64: 16, 128>}, {pipeline_mode = #tpu.pipeline_mode<synchronous>, transform_indices = @transform_7, window_bounds = array<i64: 1, 128>}, {pipeline_mode = #tpu.pipeline_mode<synchronous>, transform_indices = @transform_8, window_bounds = array<i64: 128, 128>}, {pipeline_mode = #tpu.pipeline_mode<synchronous>, transform_indices = @transform_9, window_bounds = array<i64: 1, 128>}, {transform_indices = @transform_10, window_bounds = array<i64: 16, 128>}, {transform_indices = @transform_11, window_bounds = array<i64: 2, 128>}]} {
    %c0 = arith.constant 0 : index
    %c0_0 = arith.constant 0 : index
    %0 = vector.load %arg2[%c0, %c0_0] : memref<2x16xf32, #tpu.memory_space<vmem>>, vector<2x16xf32>
    %c0_1 = arith.constant 0 : index
    %c0_2 = arith.constant 0 : index
    %1 = vector.load %arg7[%c0_1, %c0_2] : memref<16x128xf32, #tpu.memory_space<vmem>>, vector<16x128xf32>
    %c0_3 = arith.constant 0 : index
    %c0_4 = arith.constant 0 : index
    %2 = vector.load %arg8[%c0_3, %c0_4] : memref<1x128xf32, #tpu.memory_space<vmem>>, vector<1x128xf32>
    %c0_5 = arith.constant 0 : index
    %c0_6 = arith.constant 0 : index
    %3 = vector.load %arg9[%c0_5, %c0_6] : memref<128x128xf32, #tpu.memory_space<vmem>>, vector<128x128xf32>
    %c0_7 = arith.constant 0 : index
    %c0_8 = arith.constant 0 : index
    %4 = vector.load %arg10[%c0_7, %c0_8] : memref<1x128xf32, #tpu.memory_space<vmem>>, vector<1x128xf32>
    %cst = arith.constant dense<0.000000e+00> : vector<2x128xf32>
    %5 = tpu.matmul %0, %1, %cst {dimension_numbers = #tpu.dot_dimension_numbers<[1], [0], [0], [1], [0, 0, 1, 1], [], []>} : vector<2x16xf32>, vector<16x128xf32>, vector<2x128xf32> -> vector<2x128xf32>
    %6 = vector.broadcast %2 : vector<1x128xf32> to vector<2x128xf32>
    %7 = arith.addf %5, %6 : vector<2x128xf32>
    %cst_9 = arith.constant 0.000000e+00 : f32
    %8 = vector.broadcast %cst_9 : f32 to vector<2x128xf32>
    %9 = arith.maximumf %7, %8 : vector<2x128xf32>
    %cst_10 = arith.constant dense<0.000000e+00> : vector<2x128xf32>
    %10 = tpu.matmul %9, %3, %cst_10 {dimension_numbers = #tpu.dot_dimension_numbers<[1], [0], [0], [1], [0, 0, 1, 1], [], []>} : vector<2x128xf32>, vector<128x128xf32>, vector<2x128xf32> -> vector<2x128xf32>
    %11 = vector.broadcast %4 : vector<1x128xf32> to vector<2x128xf32>
    %12 = arith.addf %10, %11 : vector<2x128xf32>
    %c0_11 = arith.constant 0 : index
    %c0_12 = arith.constant 0 : index
    %13 = vector.load %arg1[%c0_11, %c0_12] : memref<16x16xf32, #tpu.memory_space<vmem>>, vector<16x16xf32>
    %c0_13 = arith.constant 0 : index
    %c0_14 = arith.constant 0 : index
    %14 = vector.load %arg3[%c0_13, %c0_14] : memref<16x128xf32, #tpu.memory_space<vmem>>, vector<16x128xf32>
    %c0_15 = arith.constant 0 : index
    %c0_16 = arith.constant 0 : index
    %15 = vector.load %arg4[%c0_15, %c0_16] : memref<1x128xf32, #tpu.memory_space<vmem>>, vector<1x128xf32>
    %c0_17 = arith.constant 0 : index
    %c0_18 = arith.constant 0 : index
    %16 = vector.load %arg5[%c0_17, %c0_18] : memref<128x128xf32, #tpu.memory_space<vmem>>, vector<128x128xf32>
    %c0_19 = arith.constant 0 : index
    %c0_20 = arith.constant 0 : index
    %17 = vector.load %arg6[%c0_19, %c0_20] : memref<1x128xf32, #tpu.memory_space<vmem>>, vector<1x128xf32>
    %cst_21 = arith.constant dense<0.000000e+00> : vector<16x128xf32>
    %18 = tpu.matmul %13, %14, %cst_21 {dimension_numbers = #tpu.dot_dimension_numbers<[1], [0], [0], [1], [0, 0, 1, 1], [], []>} : vector<16x16xf32>, vector<16x128xf32>, vector<16x128xf32> -> vector<16x128xf32>
    %19 = vector.broadcast %15 : vector<1x128xf32> to vector<16x128xf32>
    %20 = arith.addf %18, %19 : vector<16x128xf32>
    %cst_22 = arith.constant 0.000000e+00 : f32
    %21 = vector.broadcast %cst_22 : f32 to vector<16x128xf32>
    %22 = arith.maximumf %20, %21 : vector<16x128xf32>
    %cst_23 = arith.constant dense<0.000000e+00> : vector<16x128xf32>
    %23 = tpu.matmul %22, %16, %cst_23 {dimension_numbers = #tpu.dot_dimension_numbers<[1], [0], [0], [1], [0, 0, 1, 1], [], []>} : vector<16x128xf32>, vector<128x128xf32>, vector<16x128xf32> -> vector<16x128xf32>
    %24 = vector.broadcast %17 : vector<1x128xf32> to vector<16x128xf32>
    %25 = arith.addf %23, %24 : vector<16x128xf32>
    %26 = vector.shape_cast %25 : vector<16x128xf32> to vector<2x8x128xf32>
    %27 = vector.shape_cast %12 : vector<2x128xf32> to vector<2x1x128xf32>
    %28 = vector.broadcast %27 : vector<2x1x128xf32> to vector<2x8x128xf32>
    %29 = arith.mulf %26, %28 : vector<2x8x128xf32>
    %30 = vector.shape_cast %29 : vector<2x8x128xf32> to vector<16x128xf32>
    %c0_24 = arith.constant 0 : index
    %c0_25 = arith.constant 0 : index
    %31 = vector.load %arg11[%c0_24, %c0_25] : memref<16x128xf32, #tpu.memory_space<vmem>>, vector<16x128xf32>
    tpu.vector_store %arg11[%c0_24, %c0_25], %30 {strides = array<i32>} : memref<16x128xf32, #tpu.memory_space<vmem>>, vector<16x128xf32>,
    %cst_26 = arith.constant dense<0xFF800000> : vector<2x128xf32>
    %32 = vector.multi_reduction <maximumf>, %29, %cst_26 [1] : vector<2x8x128xf32> to vector<2x128xf32>
    %c0_27 = arith.constant 0 : index
    %c0_28 = arith.constant 0 : index
    %33 = vector.load %arg12[%c0_27, %c0_28] : memref<2x128xf32, #tpu.memory_space<vmem>>, vector<2x128xf32>
    tpu.vector_store %arg12[%c0_27, %c0_28], %32 {strides = array<i32>} : memref<2x128xf32, #tpu.memory_space<vmem>>, vector<2x128xf32>,
    return
  }
  func.func @transform_0(%arg0: i32) -> (i32, i32) {
    %c0_i32 = arith.constant 0 : i32
    %c0_i32_0 = arith.constant 0 : i32
    return %arg0, %c0_i32 : i32, i32
  }
  func.func @transform_1(%arg0: i32) -> (i32, i32) {
    %c0_i32 = arith.constant 0 : i32
    %c0_i32_0 = arith.constant 0 : i32
    return %arg0, %c0_i32 : i32, i32
  }
  func.func @transform_2(%arg0: i32) -> (i32, i32) {
    %c0_i32 = arith.constant 0 : i32
    %c0_i32_0 = arith.constant 0 : i32
    %c0_i32_1 = arith.constant 0 : i32
    return %c0_i32, %c0_i32_0 : i32, i32
  }
  func.func @transform_3(%arg0: i32) -> (i32, i32) {
    %c0_i32 = arith.constant 0 : i32
    %c0_i32_0 = arith.constant 0 : i32
    %c0_i32_1 = arith.constant 0 : i32
    return %c0_i32, %c0_i32_0 : i32, i32
  }
  func.func @transform_4(%arg0: i32) -> (i32, i32) {
    %c0_i32 = arith.constant 0 : i32
    %c0_i32_0 = arith.constant 0 : i32
    %c0_i32_1 = arith.constant 0 : i32
    return %c0_i32, %c0_i32_0 : i32, i32
  }
  func.func @transform_5(%arg0: i32) -> (i32, i32) {
    %c0_i32 = arith.constant 0 : i32
    %c0_i32_0 = arith.constant 0 : i32
    %c0_i32_1 = arith.constant 0 : i32
    return %c0_i32, %c0_i32_0 : i32, i32
  }
  func.func @transform_6(%arg0: i32) -> (i32, i32) {
    %c0_i32 = arith.constant 0 : i32
    %c0_i32_0 = arith.constant 0 : i32
    %c0_i32_1 = arith.constant 0 : i32
    return %c0_i32, %c0_i32_0 : i32, i32
  }
  func.func @transform_7(%arg0: i32) -> (i32, i32) {
    %c0_i32 = arith.constant 0 : i32
    %c0_i32_0 = arith.constant 0 : i32
    %c0_i32_1 = arith.constant 0 : i32
    return %c0_i32, %c0_i32_0 : i32, i32
  }
  func.func @transform_8(%arg0: i32) -> (i32, i32) {
    %c0_i32 = arith.constant 0 : i32
    %c0_i32_0 = arith.constant 0 : i32
    %c0_i32_1 = arith.constant 0 : i32
    return %c0_i32, %c0_i32_0 : i32, i32
  }
  func.func @transform_9(%arg0: i32) -> (i32, i32) {
    %c0_i32 = arith.constant 0 : i32
    %c0_i32_0 = arith.constant 0 : i32
    %c0_i32_1 = arith.constant 0 : i32
    return %c0_i32, %c0_i32_0 : i32, i32
  }
  func.func @transform_10(%arg0: i32) -> (i32, i32) {
    %c0_i32 = arith.constant 0 : i32
    %c0_i32_0 = arith.constant 0 : i32
    return %arg0, %c0_i32 : i32, i32
  }
  func.func @transform_11(%arg0: i32) -> (i32, i32) {
    %c0_i32 = arith.constant 0 : i32
    %c0_i32_0 = arith.constant 0 : i32
    return %arg0, %c0_i32 : i32, i32
  }
}

</mosaic_0001>

<bundles_post_ra>
// kernel: tpu_custom_call.1
= control target key start
LH: loop header
LB: loop body
LE: loop exit
PB: predicated region body
PF: predicated region fallthrough
CT: control target
= control target key end

     0   :  { %17 = vsyncpa [#allocation3], 0  ;;  %s715_s0 = inlined_call_operand.hbm [shape: f32[16,16], index: 0, kind: input, shape index: {}]   ;;  %s716_s1 = inlined_call_operand.hbm [shape: f32[2,16], index: 1, kind: input, shape index: {}]   ;;  %s717_s2 = inlined_call_operand.hbm [shape: f32[16,128], index: 2, kind: input, shape index: {}]   ;;  %s718_s3 = inlined_call_operand.vmem [shape: f32[1,128], index: 3, kind: input, shape index: {}]   ;;  %s719_s4 = inlined_call_operand.hbm [shape: f32[128,128], index: 4, kind: input, shape index: {}]   ;;  %s720_s5 = inlined_call_operand.vmem [shape: f32[1,128], index: 5, kind: input, shape index: {}]   ;;  %s721_s6 = inlined_call_operand.hbm [shape: f32[16,128], index: 6, kind: input, shape index: {}]   ;;  %s722_s7 = inlined_call_operand.vmem [shape: f32[1,128], index: 7, kind: input, shape index: {}]   ;;  %s723_s8 = inlined_call_operand.hbm [shape: f32[128,128], index: 8, kind: input, shape index: {}]   ;;  %s724_s9 = inlined_call_operand.vmem [shape: f32[1,128], index: 9, kind: input, shape index: {}]   ;;  %s725_s10 = inlined_call_operand.hbm [shape: f32[16,128], index: 10, kind: output, shape index: {0}]   ;;  %s726_s11 = inlined_call_operand.hbm [shape: f32[2,128], index: 11, kind: output, shape index: {1}]  }
   0x1   :  { %18 = vsyncpa [#allocation6], 0 }
   0x2   :  { %19 = vsyncpa [#allocation9], 0 }
   0x3   :  { %20 = vsyncpa [#allocation12], 0 }
   0x4   :  { %21 = vsyncpa [#allocation4], 0  ;;  %s41_s19 = sshll.u32 %s716_s1, 4  ;;  %s42_s19 = int_to_ptr.hbm [resolvable:$true] %s41_s19 }
   0x5   :  { %22 = vsyncpa [#allocation15], 0  ;;  %s588_s20 = smov [#allocation5]   ;;  %s66_s24 = sshll.u32 %s719_s4, 4  ;;  %s67_s24 = int_to_ptr.hbm [resolvable:$true] %s66_s24 }
   0x6   :  { %s43_s21 = sshll.u32 %s588_s20, 4  ;;  %s589_s25 = smov [#allocation8]   ;;  %s44_s21 = int_to_ptr.vmem [resolvable:$true] %s43_s21 }
   0x7   :  { %46 = dma.hbm_to_vmem [thread:$0]  %s42_s19, 32, %s44_s21, [#allocation6]  }
   0x8   :  { %s68_s26 = sshll.u32 %s589_s25, 4  ;;  %s27_s29 = sshll.u32 %s715_s0, 4  ;;  %s69_s26 = int_to_ptr.vmem [resolvable:$true] %s68_s26  ;;  %s28_s29 = int_to_ptr.hbm [resolvable:$true] %s27_s29 }
   0x9   :  { %s590_s1 = smov 128   ;;  %s591_s30 = smov 8  }
   0xa   :  { %74 = dma.hbm_to_vmem [thread:$0]  %s67_s24, 2048, %s69_s26, [#allocation9], %s590_s1, %s590_s1, %s591_s30  }
   0xb   :  { %s51_s14 = sshll.u32 %s717_s2, 4  ;;  %s592_s4 = smov [#allocation2]   ;;  %s52_s14 = int_to_ptr.hbm [resolvable:$true] %s51_s14 }
   0xc   :  { %s29_s15 = sshll.u32 %s592_s4, 4  ;;  %s593_s0 = smov [#allocation7]   ;;  %s30_s15 = int_to_ptr.vmem [resolvable:$true] %s29_s15 }
   0xd   :  { %35 = dma.hbm_to_vmem [thread:$0]  %s28_s29, 256, %s30_s15, [#allocation3], %s590_s1, %s590_s1, %s591_s30  }
   0xe   :  { %s53_s16 = sshll.u32 %s593_s0, 4  ;;  %s81_s19 = sshll.u32 %s721_s6, 4  ;;  %s54_s16 = int_to_ptr.vmem [resolvable:$true] %s53_s16  ;;  %s82_s19 = int_to_ptr.hbm [resolvable:$true] %s81_s19 }
   0xf   :  { %59 = dma.hbm_to_vmem [thread:$0]  %s52_s14, 256, %s54_s16, [#allocation6], %s590_s1, %s590_s1, %s591_s30  }
  0x10   :  { %s96_s21 = sshll.u32 %s723_s8, 4  ;;  %s594_s22 = smov [#allocation10]   ;;  %s97_s21 = int_to_ptr.hbm [resolvable:$true] %s96_s21 }
  0x11   :  { %s83_s23 = sshll.u32 %s594_s22, 4  ;;  %s595_s24 = smov [#allocation11]   ;;  %s84_s23 = int_to_ptr.vmem [resolvable:$true] %s83_s23 }
  0x12   :  { %89 = dma.hbm_to_vmem [thread:$0]  %s82_s19, 256, %s84_s23, [#allocation9], %s590_s1, %s590_s1, %s591_s30  }
  0x13   :  { %s98_s6 = sshll.u32 %s595_s24, 4  ;;  %s99_s6 = int_to_ptr.vmem [resolvable:$true] %s98_s6 }
  0x14   :  { %104 = dma.hbm_to_vmem [thread:$0]  %s97_s21, 2048, %s99_s6, [#allocation12], %s590_s1, %s590_s1, %s591_s30  }
  0x15   :  { %576 = dma.done.wait [#allocation3], 256  }
  0x16   :  { %577 = vsyncadd [#allocation3], 4294967040 }
  0x17   :  { %578 = dma.done.wait [#allocation6], 288  }
  0x18   :  { %579 = vsyncadd [#allocation6], 4294967008 }
  0x19   :  { %580 = dma.done.wait [#allocation9], 2304  }
  0x1a   :  { %581 = vsyncadd [#allocation9], 4294964992 }
  0x1b   :  { %582 = dma.done.wait [#allocation12], 2048  }
  0x1c   :  { %583 = vsyncadd [#allocation12], 4294965248  ;;  %v133_v0 = vld [vmem:[#allocation10 + $0x8] sm:$0xff]  ;;  %v132_v1 = vld [vmem:[#allocation10] sm:$0xff]  ;;  %vm155_vm0 = vcmask 130048   ;;  %s333_s16 = sshll.u32 %s726_s11, 4  ;;  %s334_s16 = int_to_ptr.hbm [resolvable:$true] %s333_s16 }
  0x1d   :  { %173 = vmatpush.msra.mxu2 %v133_v0  ;;  %v131_v2 = vld [vmem:[#allocation5] sm:$0x3]  ;;  %v206_v3 = vld [vmem:[#allocation7 + $0x8] sm:$0xff]  ;;  %v149_v5 = vld [vmem:[#allocation11 + $0x70] sm:$0xff]  ;;  %vm309_vm1 = vcmask 1041409  }
  0x1e   :  { %v150_v4 = vld [vmem:[#allocation11 + $0x78] sm:$0xff]  ;;  %v205_v6 = vld [vmem:[#allocation7] sm:$0xff]  ;;  %v148_v7 = vld [vmem:[#allocation11 + $0x68] sm:$0xff] }
  0x1f   :  { %174 = vmatpush.msra.mxu2 %v132_v1  ;;  %183 = vmatpush.msra.mxu1 %v150_v4  ;;  %v223_v8 = vld [vmem:[#allocation8 + $0x78] sm:$0xff]  ;;  %v222_v9 = vld [vmem:[#allocation8 + $0x70] sm:$0xff]  ;;  %v221_v11 = vld [vmem:[#allocation8 + $0x68] sm:$0xff] }
  0x20   :  { %351 = vmatmul.msk.f32.vlgmr.msra.gmra.mxu2 %vm155_vm0, %v131_v2  ;;  %v147_v10 = vld [vmem:[#allocation11 + $0x60] sm:$0xff]  ;;  %262 = vmatpush.msra.mxu0 %v223_v8  ;;  %v146_v12 = vld [vmem:[#allocation11 + $0x58] sm:$0xff]  ;;  %v203_v13 = vld [vmem:[#allocation2] sm:$0xff] }
  0x21   :  { %248 = vmatpush.msrb.mxu2 %v206_v3  ;;  %184 = vmatpush.msra.mxu1 %v149_v5  ;;  %v220_v14 = vld [vmem:[#allocation8 + $0x60] sm:$0xff]  ;;  %v219_v16 = vld [vmem:[#allocation8 + $0x58] sm:$0xff]  ;;  %v218_v18 = vld [vmem:[#allocation8 + $0x50] sm:$0xff] }
  0x22   :  { %354 = vmatpush.msra.mxu3 %v223_v8  ;;  %263 = vmatpush.msra.mxu0 %v222_v9  ;;  %v145_v15 = vld [vmem:[#allocation11 + $0x50] sm:$0xff]  ;;  %v144_v17 = vld [vmem:[#allocation11 + $0x48] sm:$0xff]  ;;  %v143_v19 = vld [vmem:[#allocation11 + $0x40] sm:$0xff] }
  0x23   :  { %249 = vmatpush.msrb.mxu2 %v205_v6  ;;  %185 = vmatpush.msra.mxu1 %v148_v7  ;;  %v217_v20 = vld [vmem:[#allocation8 + $0x48] sm:$0xff]  ;;  %v216_v23 = vld [vmem:[#allocation8 + $0x40] sm:$0xff]  ;;  %v215_v25 = vld [vmem:[#allocation8 + $0x38] sm:$0xff] }
  0x24   :  { %355 = vmatpush.msra.mxu3 %v222_v9  ;;  %264 = vmatpush.msra.mxu0 %v221_v11  ;;  %v142_v21 = vld [vmem:[#allocation11 + $0x38] sm:$0xff]  ;;  %v141_v24 = vld [vmem:[#allocation11 + $0x30] sm:$0xff]  ;;  %v140_v26 = vld [vmem:[#allocation11 + $0x28] sm:$0xff] }
  0x25   :  { %186 = vmatpush.msra.mxu1 %v147_v10  ;;  %v204_v22 = vld [vmem:[#allocation2 + $0x8] sm:$0xff]  ;;  %v139_v27 = vld [vmem:[#allocation11 + $0x20] sm:$0xff]  ;;  %v136_v31 = vld [vmem:[#allocation11 + $0x8] sm:$0xff] }
  0x26   :  { %356 = vmatpush.msra.mxu3 %v221_v11  ;;  %265 = vmatpush.msra.mxu0 %v220_v14  ;;  %v138_v28 = vld [vmem:[#allocation11 + $0x18] sm:$0xff]  ;;  %v137_v29 = vld [vmem:[#allocation11 + $0x10] sm:$0xff]  ;;  %v214_v30 = vld [vmem:[#allocation8 + $0x30] sm:$0xff] }
  0x27   :  { %187 = vmatpush.msra.mxu1 %v146_v12  ;;  %v213_v32 = vld [vmem:[#allocation8 + $0x28] sm:$0xff]  ;;  %v135_v33 = vld [vmem:[#allocation11] sm:$0xff]  ;;  %v212_v34 = vld [vmem:[#allocation8 + $0x20] sm:$0xff] }
  0x28   :  { %352 = vmatmul.msk.f32.vlgmr.msrb.gmra.mxu2 %vm155_vm0, %v203_v13  ;;  %357 = vmatpush.msra.mxu3 %v220_v14  ;;  %v211_v35 = vld [vmem:[#allocation8 + $0x18] sm:$0xff]  ;;  %v210_v36 = vld [vmem:[#allocation8 + $0x10] sm:$0xff]  ;;  %v209_v37 = vld [vmem:[#allocation8 + $0x8] sm:$0xff] }
  0x29   :  { %188 = vmatpush.msra.mxu1 %v145_v15  ;;  %266 = vmatpush.msra.mxu0 %v219_v16  ;;  %v208_v38 = vld [vmem:[#allocation8] sm:$0xff]  ;;  %v380_v39 = vld [vmem:[%s722_s7] ss:$0 sm:$0xff] }
  0x2a   :  { %358 = vmatpush.msra.mxu3 %v219_v16  ;;  %v381_v43 = vld [vmem:[%s718_s3] ss:$0 sm:$0xff]  ;;  %s596_s3 = smov [#allocation13]  }
  0x2b   :  { %189 = vmatpush.msra.mxu1 %v144_v17  ;;  %267 = vmatpush.msra.mxu0 %v218_v18  ;;  %v382_v50 = vld [vmem:[%s724_s9] ss:$0 sm:$0xff]  ;;  %s317_s13 = sshll.u32 %s596_s3, 4  ;;  %s319_s9 = sshll.u32 %s725_s10, 4  ;;  %s318_s13 = int_to_ptr.vmem [resolvable:$true] %s317_s13  ;;  %s320_s9 = int_to_ptr.hbm [resolvable:$true] %s319_s9 }
  0x2c   :  { %359 = vmatpush.msra.mxu3 %v218_v18  ;;  %v383_v53 = vld [vmem:[%s720_s5] ss:$0 sm:$0xff]  ;;  %s597_s5 = smov [#allocation14]  }
  0x2d   :  { %190 = vmatpush.msra.mxu1 %v143_v19  ;;  %268 = vmatpush.msra.mxu0 %v217_v20  ;;  %s331_s10 = sshll.u32 %s597_s5, 4  ;;  %s332_s10 = int_to_ptr.vmem [resolvable:$true] %s331_s10 }
  0x2e   :  { %360 = vmatpush.msra.mxu3 %v217_v20 }
  0x2f   :  { %191 = vmatpush.msra.mxu1 %v142_v21  ;;  %269 = vmatpush.msra.mxu0 %v216_v23 }
  0x30   :  { %353 = vmatmul.msk.f32.gmra.mxu2 %vm155_vm0, %v204_v22  ;;  %361 = vmatpush.msra.mxu3 %v216_v23 }
  0x31   :  { %192 = vmatpush.msra.mxu1 %v141_v24  ;;  %270 = vmatpush.msra.mxu0 %v215_v25 }
  0x32   :  { %362 = vmatpush.msra.mxu3 %v215_v25 }
  0x33   :  { %193 = vmatpush.msra.mxu1 %v140_v26  ;;  %271 = vmatpush.msra.mxu0 %v214_v30 }
  0x34   :  { %363 = vmatpush.msra.mxu3 %v214_v30 }
  0x35   :  { %194 = vmatpush.msra.mxu1 %v139_v27  ;;  %272 = vmatpush.msra.mxu0 %v213_v32 }
  0x36   :  { %364 = vmatpush.msra.mxu3 %v213_v32 }
  0x37   :  { %195 = vmatpush.msra.mxu1 %v138_v28  ;;  %273 = vmatpush.msra.mxu0 %v212_v34 }
  0x38   :  { %365 = vmatpush.msra.mxu3 %v212_v34 }
  0x39   :  { %196 = vmatpush.msra.mxu1 %v137_v29  ;;  %274 = vmatpush.msra.mxu0 %v211_v35 }
  0x3a   :  { %366 = vmatpush.msra.mxu3 %v211_v35 }
  0x3b   :  { %197 = vmatpush.msra.mxu1 %v136_v31  ;;  %275 = vmatpush.msra.mxu0 %v210_v36 }
  0x3c   :  { %367 = vmatpush.msra.mxu3 %v210_v36 }
  0x3d   :  { %198 = vmatpush.msra.mxu1 %v135_v33  ;;  %276 = vmatpush.msra.mxu0 %v209_v37 }
  0x3e   :  { %368 = vmatpush.msra.mxu3 %v209_v37 }
  0x3f   :  { %277 = vmatpush.msra.mxu0 %v208_v38 }
  0x40   :  { %369 = vmatpush.msra.mxu3 %v208_v38 }
  0xa3   :  { %v176_v40 = vpop.f32.mrf.mxu2 }
  0xa4   :  { %v177_v41 = vadd.f32 %v380_v39, %v176_v40 }
  0xa6   :  { %v179_v42 = vmax.f32 %v177_v41, 0.0 }
  0xa8   :  { %199 = vmatmul.f32.vlgmr.msra.gmra.mxu1 %v179_v42 }
  0xab   :  { %v251_v44 = vpop.f32.mrf.mxu2 }
  0xac   :  { %v252_v45 = vadd.f32 %v381_v43, %v251_v44 }
  0xae   :  { %v257_v46 = vmax.f32 %v252_v45, 0.0 }
  0xb0   :  { %278 = vmatmul.f32.vlgmr.msra.gmra.mxu0 %v257_v46 }
  0xb3   :  { %v254_v47 = vpop.f32.mrf.mxu2 }
  0xb4   :  { %v255_v48 = vadd.f32 %v381_v43, %v254_v47 }
  0xb6   :  { %v258_v49 = vmax.f32 %v255_v48, 0.0 }
  0xb8   :  { %281 = vmatmul.f32.vlgmr.msra.gmra.mxu3 %v258_v49 }
 0x125   :  { %v200_v51 = vpop.f32.mrf.mxu1 }
 0x126   :  { %v201_v52 = vadd.f32 %v382_v50, %v200_v51 }
 0x128   :  { %v287_v55 = vperm.slane %v201_v52, 0  ;;  %v286_v59 = vrot.slane %v201_v52, 1 }
 0x12a   :  { %v288_v62 = vperm.slane %v286_v59, 0 }
 0x12d   :  { %v279_v54 = vpop.f32.mrf.mxu0 }
 0x12e   :  { %v280_v56 = vadd.f32 %v383_v53, %v279_v54 }
 0x130   :  { %v291_v57 = vmul.f32 %v287_v55, %v280_v56 }
 0x132   :  { %293 = vst [vmem:[#allocation13] sm:$0xff] %v291_v57  ;;  %v295_v58 = vrot.slane %v291_v57, 4 }
 0x134   :  { %v296_v60 = vmax.f32 %v291_v57, %v295_v58 }
 0x136   :  { %v297_v0 = vrot.slane %v296_v60, 2 }
 0x138   :  { %v298_v3 = vmax.f32 %v296_v60, %v297_v0 }
 0x13a   :  { %v299_v7 = vrot.slane %v298_v3, 1 }
 0x13b   :  { %v282_v61 = vpop.f32.mrf.mxu3 }
 0x13c   :  { %v283_v63 = vadd.f32 %v383_v53, %v282_v61  ;;  %v300_v9 = vmax.f32 %v298_v3, %v299_v7 }
 0x13e   :  { %v292_v1 = vmul.f32 %v288_v62, %v283_v63 }
 0x140   :  { %v301_v2 = vrot.slane %v292_v1, 4  ;;  %294 = vst [vmem:[#allocation13 + $0x8] sm:$0xff] %v292_v1 }
 0x141   :  { %325 = dma.vmem_to_hbm [thread:$0]  %s318_s13, 256, %s320_s9, [#allocation4], %s590_s1, %s590_s1, %s591_s30  }
 0x142   :  { %v302_v4 = vmax.f32 %v292_v1, %v301_v2 }
 0x144   :  { %v303_v5 = vrot.slane %v302_v4, 2 }
 0x146   :  { %v304_v6 = vmax.f32 %v302_v4, %v303_v5 }
 0x148   :  { %v305_v8 = vrot.slane %v304_v6, 1 }
 0x14a   :  { %v306_v10 = vmax.f32 %v304_v6, %v305_v8 }
 0x14c   :  { %v310_v11 = vsel %vm309_vm1, %v306_v10, %v300_v9 }
 0x14d   :  { %312 = vst [vmem:[#allocation14] sm:$0x3] %v310_v11 }
 0x14e   :  { %336 = dma.vmem_to_hbm [thread:$0]  %s332_s10, 32, %s334_s16, [#allocation15]  }
 0x14f   :  { %584 = dma.done.wait [#allocation4], 256  }
 0x150   :  { %585 = vsyncadd [#allocation4], 4294967040 }
 0x151   :  { %586 = dma.done.wait [#allocation15], 32  }
 0x152   :  { %587 = vsyncadd [#allocation15], 4294967264 }
 0x153   :  { %345 = vsyncpa [#allocation3], 1 }
 0x154   :  { %346 = vsyncpa [#allocation6], 1 }
 0x155   :  { %347 = vsyncpa [#allocation9], 1 }
 0x156   :  { %348 = vsyncpa [#allocation12], 1 }
 0x157   :  { %349 = vsyncpa [#allocation4], 1 }
 0x158   :  { %350 = vsyncpa [#allocation15], 1 }

// kernel: tpu_custom_call.1
= control target key start
LH: loop header
LB: loop body
LE: loop exit
PB: predicated region body
PF: predicated region fallthrough
CT: control target
= control target key end

     0   :  { %17 = vsyncpa [#allocation3], 0  ;;  %s715_s0 = inlined_call_operand.hbm [shape: f32[16,16], index: 0, kind: input, shape index: {}]   ;;  %s716_s1 = inlined_call_operand.hbm [shape: f32[2,16], index: 1, kind: input, shape index: {}]   ;;  %s717_s2 = inlined_call_operand.hbm [shape: f32[16,128], index: 2, kind: input, shape index: {}]   ;;  %s718_s3 = inlined_call_operand.vmem [shape: f32[1,128], index: 3, kind: input, shape index: {}]   ;;  %s719_s4 = inlined_call_operand.hbm [shape: f32[128,128], index: 4, kind: input, shape index: {}]   ;;  %s720_s5 = inlined_call_operand.vmem [shape: f32[1,128], index: 5, kind: input, shape index: {}]   ;;  %s721_s6 = inlined_call_operand.hbm [shape: f32[16,128], index: 6, kind: input, shape index: {}]   ;;  %s722_s7 = inlined_call_operand.vmem [shape: f32[1,128], index: 7, kind: input, shape index: {}]   ;;  %s723_s8 = inlined_call_operand.hbm [shape: f32[128,128], index: 8, kind: input, shape index: {}]   ;;  %s724_s9 = inlined_call_operand.vmem [shape: f32[1,128], index: 9, kind: input, shape index: {}]   ;;  %s725_s10 = inlined_call_operand.hbm [shape: f32[16,128], index: 10, kind: output, shape index: {0}]   ;;  %s726_s11 = inlined_call_operand.hbm [shape: f32[2,128], index: 11, kind: output, shape index: {1}]  }
   0x1   :  { %18 = vsyncpa [#allocation6], 0 }
   0x2   :  { %19 = vsyncpa [#allocation9], 0 }
   0x3   :  { %20 = vsyncpa [#allocation12], 0 }
   0x4   :  { %21 = vsyncpa [#allocation4], 0  ;;  %s41_s19 = sshll.u32 %s716_s1, 4  ;;  %s42_s19 = int_to_ptr.hbm [resolvable:$true] %s41_s19 }
   0x5   :  { %22 = vsyncpa [#allocation15], 0  ;;  %s588_s20 = smov [#allocation5]   ;;  %s66_s24 = sshll.u32 %s719_s4, 4  ;;  %s67_s24 = int_to_ptr.hbm [resolvable:$true] %s66_s24 }
   0x6   :  { %s43_s21 = sshll.u32 %s588_s20, 4  ;;  %s589_s25 = smov [#allocation8]   ;;  %s44_s21 = int_to_ptr.vmem [resolvable:$true] %s43_s21 }
   0x7   :  { %46 = dma.hbm_to_vmem [thread:$0]  %s42_s19, 32, %s44_s21, [#allocation6]  }
   0x8   :  { %s68_s26 = sshll.u32 %s589_s25, 4  ;;  %s27_s29 = sshll.u32 %s715_s0, 4  ;;  %s69_s26 = int_to_ptr.vmem [resolvable:$true] %s68_s26  ;;  %s28_s29 = int_to_ptr.hbm [resolvable:$true] %s27_s29 }
   0x9   :  { %s590_s1 = smov 128   ;;  %s591_s30 = smov 8  }
   0xa   :  { %74 = dma.hbm_to_vmem [thread:$0]  %s67_s24, 2048, %s69_s26, [#allocation9], %s590_s1, %s590_s1, %s591_s30  }
   0xb   :  { %s51_s14 = sshll.u32 %s717_s2, 4  ;;  %s592_s4 = smov [#allocation2]   ;;  %s52_s14 = int_to_ptr.hbm [resolvable:$true] %s51_s14 }
   0xc   :  { %s29_s15 = sshll.u32 %s592_s4, 4  ;;  %s593_s0 = smov [#allocation7]   ;;  %s30_s15 = int_to_ptr.vmem [resolvable:$true] %s29_s15 }
   0xd   :  { %35 = dma.hbm_to_vmem [thread:$0]  %s28_s29, 256, %s30_s15, [#allocation3], %s590_s1, %s590_s1, %s591_s30  }
   0xe   :  { %s53_s16 = sshll.u32 %s593_s0, 4  ;;  %s81_s19 = sshll.u32 %s721_s6, 4  ;;  %s54_s16 = int_to_ptr.vmem [resolvable:$true] %s53_s16  ;;  %s82_s19 = int_to_ptr.hbm [resolvable:$true] %s81_s19 }
   0xf   :  { %59 = dma.hbm_to_vmem [thread:$0]  %s52_s14, 256, %s54_s16, [#allocation6], %s590_s1, %s590_s1, %s591_s30  }
  0x10   :  { %s96_s21 = sshll.u32 %s723_s8, 4  ;;  %s594_s22 = smov [#allocation10]   ;;  %s97_s21 = int_to_ptr.hbm [resolvable:$true] %s96_s21 }
  0x11   :  { %s83_s23 = sshll.u32 %s594_s22, 4  ;;  %s595_s24 = smov [#allocation11]   ;;  %s84_s23 = int_to_ptr.vmem [resolvable:$true] %s83_s23 }
  0x12   :  { %89 = dma.hbm_to_vmem [thread:$0]  %s82_s19, 256, %s84_s23, [#allocation9], %s590_s1, %s590_s1, %s591_s30  }
  0x13   :  { %s98_s6 = sshll.u32 %s595_s24, 4  ;;  %s99_s6 = int_to_ptr.vmem [resolvable:$true] %s98_s6 }
  0x14   :  { %104 = dma.hbm_to_vmem [thread:$0]  %s97_s21, 2048, %s99_s6, [#allocation12], %s590_s1, %s590_s1, %s591_s30  }
  0x15   :  { %576 = dma.done.wait [#allocation3], 256  }
  0x16   :  { %577 = vsyncadd [#allocation3], 4294967040 }
  0x17   :  { %578 = dma.done.wait [#allocation6], 288  }
  0x18   :  { %579 = vsyncadd [#allocation6], 4294967008 }
  0x19   :  { %580 = dma.done.wait [#allocation9], 2304  }
  0x1a   :  { %581 = vsyncadd [#allocation9], 4294964992 }
  0x1b   :  { %582 = dma.done.wait [#allocation12], 2048  }
  0x1c   :  { %583 = vsyncadd [#allocation12], 4294965248  ;;  %v133_v0 = vld [vmem:[#allocation10 + $0x8] sm:$0xff]  ;;  %v132_v1 = vld [vmem:[#allocation10] sm:$0xff]  ;;  %vm155_vm0 = vcmask 130048   ;;  %s333_s16 = sshll.u32 %s726_s11, 4  ;;  %s334_s16 = int_to_ptr.hbm [resolvable:$true] %s333_s16 }
  0x1d   :  { %173 = vmatpush.msra.mxu2 %v133_v0  ;;  %v131_v2 = vld [vmem:[#allocation5] sm:$0x3]  ;;  %v206_v3 = vld [vmem:[#allocation7 + $0x8] sm:$0xff]  ;;  %v149_v5 = vld [vmem:[#allocation11 + $0x70] sm:$0xff]  ;;  %vm309_vm1 = vcmask 1041409  }
  0x1e   :  { %v150_v4 = vld [vmem:[#allocation11 + $0x78] sm:$0xff]  ;;  %v205_v6 = vld [vmem:[#allocation7] sm:$0xff]  ;;  %v148_v7 = vld [vmem:[#allocation11 + $0x68] sm:$0xff] }
  0x1f   :  { %174 = vmatpush.msra.mxu2 %v132_v1  ;;  %183 = vmatpush.msra.mxu1 %v150_v4  ;;  %v223_v8 = vld [vmem:[#allocation8 + $0x78] sm:$0xff]  ;;  %v222_v9 = vld [vmem:[#allocation8 + $0x70] sm:$0xff]  ;;  %v221_v11 = vld [vmem:[#allocation8 + $0x68] sm:$0xff] }
  0x20   :  { %351 = vmatmul.msk.f32.vlgmr.msra.gmra.mxu2 %vm155_vm0, %v131_v2  ;;  %v147_v10 = vld [vmem:[#allocation11 + $0x60] sm:$0xff]  ;;  %262 = vmatpush.msra.mxu0 %v223_v8  ;;  %v146_v12 = vld [vmem:[#allocation11 + $0x58] sm:$0xff]  ;;  %v203_v13 = vld [vmem:[#allocation2] sm:$0xff] }
  0x21   :  { %248 = vmatpush.msrb.mxu2 %v206_v3  ;;  %184 = vmatpush.msra.mxu1 %v149_v5  ;;  %v220_v14 = vld [vmem:[#allocation8 + $0x60] sm:$0xff]  ;;  %v219_v16 = vld [vmem:[#allocation8 + $0x58] sm:$0xff]  ;;  %v218_v18 = vld [vmem:[#allocation8 + $0x50] sm:$0xff] }
  0x22   :  { %354 = vmatpush.msra.mxu3 %v223_v8  ;;  %263 = vmatpush.msra.mxu0 %v222_v9  ;;  %v145_v15 = vld [vmem:[#allocation11 + $0x50] sm:$0xff]  ;;  %v144_v17 = vld [vmem:[#allocation11 + $0x48] sm:$0xff]  ;;  %v143_v19 = vld [vmem:[#allocation11 + $0x40] sm:$0xff] }
  0x23   :  { %249 = vmatpush.msrb.mxu2 %v205_v6  ;;  %185 = vmatpush.msra.mxu1 %v148_v7  ;;  %v217_v20 = vld [vmem:[#allocation8 + $0x48] sm:$0xff]  ;;  %v216_v23 = vld [vmem:[#allocation8 + $0x40] sm:$0xff]  ;;  %v215_v25 = vld [vmem:[#allocation8 + $0x38] sm:$0xff] }
  0x24   :  { %355 = vmatpush.msra.mxu3 %v222_v9  ;;  %264 = vmatpush.msra.mxu0 %v221_v11  ;;  %v142_v21 = vld [vmem:[#allocation11 + $0x38] sm:$0xff]  ;;  %v141_v24 = vld [vmem:[#allocation11 + $0x30] sm:$0xff]  ;;  %v140_v26 = vld [vmem:[#allocation11 + $0x28] sm:$0xff] }
  0x25   :  { %186 = vmatpush.msra.mxu1 %v147_v10  ;;  %v204_v22 = vld [vmem:[#allocation2 + $0x8] sm:$0xff]  ;;  %v139_v27 = vld [vmem:[#allocation11 + $0x20] sm:$0xff]  ;;  %v136_v31 = vld [vmem:[#allocation11 + $0x8] sm:$0xff] }
  0x26   :  { %356 = vmatpush.msra.mxu3 %v221_v11  ;;  %265 = vmatpush.msra.mxu0 %v220_v14  ;;  %v138_v28 = vld [vmem:[#allocation11 + $0x18] sm:$0xff]  ;;  %v137_v29 = vld [vmem:[#allocation11 + $0x10] sm:$0xff]  ;;  %v214_v30 = vld [vmem:[#allocation8 + $0x30] sm:$0xff] }
  0x27   :  { %187 = vmatpush.msra.mxu1 %v146_v12  ;;  %v213_v32 = vld [vmem:[#allocation8 + $0x28] sm:$0xff]  ;;  %v135_v33 = vld [vmem:[#allocation11] sm:$0xff]  ;;  %v212_v34 = vld [vmem:[#allocation8 + $0x20] sm:$0xff] }
  0x28   :  { %352 = vmatmul.msk.f32.vlgmr.msrb.gmra.mxu2 %vm155_vm0, %v203_v13  ;;  %357 = vmatpush.msra.mxu3 %v220_v14  ;;  %v211_v35 = vld [vmem:[#allocation8 + $0x18] sm:$0xff]  ;;  %v210_v36 = vld [vmem:[#allocation8 + $0x10] sm:$0xff]  ;;  %v209_v37 = vld [vmem:[#allocation8 + $0x8] sm:$0xff] }
  0x29   :  { %188 = vmatpush.msra.mxu1 %v145_v15  ;;  %266 = vmatpush.msra.mxu0 %v219_v16  ;;  %v208_v38 = vld [vmem:[#allocation8] sm:$0xff]  ;;  %v380_v39 = vld [vmem:[%s722_s7] ss:$0 sm:$0xff] }
  0x2a   :  { %358 = vmatpush.msra.mxu3 %v219_v16  ;;  %v381_v43 = vld [vmem:[%s718_s3] ss:$0 sm:$0xff]  ;;  %s596_s3 = smov [#allocation13]  }
  0x2b   :  { %189 = vmatpush.msra.mxu1 %v144_v17  ;;  %267 = vmatpush.msra.mxu0 %v218_v18  ;;  %v382_v50 = vld [vmem:[%s724_s9] ss:$0 sm:$0xff]  ;;  %s317_s13 = sshll.u32 %s596_s3, 4  ;;  %s319_s9 = sshll.u32 %s725_s10, 4  ;;  %s318_s13 = int_to_ptr.vmem [resolvable:$true] %s317_s13  ;;  %s320_s9 = int_to_ptr.hbm [resolvable:$true] %s319_s9 }
  0x2c   :  { %359 = vmatpush.msra.mxu3 %v218_v18  ;;  %v383_v53 = vld [vmem:[%s720_s5] ss:$0 sm:$0xff]  ;;  %s597_s5 = smov [#allocation14]  }
  0x2d   :  { %190 = vmatpush.msra.mxu1 %v143_v19  ;;  %268 = vmatpush.msra.mxu0 %v217_v20  ;;  %s331_s10 = sshll.u32 %s597_s5, 4  ;;  %s332_s10 = int_to_ptr.vmem [resolvable:$true] %s331_s10 }
  0x2e   :  { %360 = vmatpush.msra.mxu3 %v217_v20 }
  0x2f   :  { %191 = vmatpush.msra.mxu1 %v142_v21  ;;  %269 = vmatpush.msra.mxu0 %v216_v23 }
  0x30   :  { %353 = vmatmul.msk.f32.gmra.mxu2 %vm155_vm0, %v204_v22  ;;  %361 = vmatpush.msra.mxu3 %v216_v23 }
  0x31   :  { %192 = vmatpush.msra.mxu1 %v141_v24  ;;  %270 = vmatpush.msra.mxu0 %v215_v25 }
  0x32   :  { %362 = vmatpush.msra.mxu3 %v215_v25 }
  0x33   :  { %193 = vmatpush.msra.mxu1 %v140_v26  ;;  %271 = vmatpush.msra.mxu0 %v214_v30 }
  0x34   :  { %363 = vmatpush.msra.mxu3 %v214_v30 }
  0x35   :  { %194 = vmatpush.msra.mxu1 %v139_v27  ;;  %272 = vmatpush.msra.mxu0 %v213_v32 }
  0x36   :  { %364 = vmatpush.msra.mxu3 %v213_v32 }
  0x37   :  { %195 = vmatpush.msra.mxu1 %v138_v28  ;;  %273 = vmatpush.msra.mxu0 %v212_v34 }
  0x38   :  { %365 = vmatpush.msra.mxu3 %v212_v34 }
  0x39   :  { %196 = vmatpush.msra.mxu1 %v137_v29  ;;  %274 = vmatpush.msra.mxu0 %v211_v35 }
  0x3a   :  { %366 = vmatpush.msra.mxu3 %v211_v35 }
  0x3b   :  { %197 = vmatpush.msra.mxu1 %v136_v31  ;;  %275 = vmatpush.msra.mxu0 %v210_v36 }
  0x3c   :  { %367 = vmatpush.msra.mxu3 %v210_v36 }
  0x3d   :  { %198 = vmatpush.msra.mxu1 %v135_v33  ;;  %276 = vmatpush.msra.mxu0 %v209_v37 }
  0x3e   :  { %368 = vmatpush.msra.mxu3 %v209_v37 }
  0x3f   :  { %277 = vmatpush.msra.mxu0 %v208_v38 }
  0x40   :  { %369 = vmatpush.msra.mxu3 %v208_v38 }
  0xa3   :  { %v176_v40 = vpop.f32.mrf.mxu2 }
  0xa4   :  { %v177_v41 = vadd.f32 %v380_v39, %v176_v40 }
  0xa6   :  { %v179_v42 = vmax.f32 %v177_v41, 0.0 }
  0xa8   :  { %199 = vmatmul.f32.vlgmr.msra.gmra.mxu1 %v179_v42 }
  0xab   :  { %v251_v44 = vpop.f32.mrf.mxu2 }
  0xac   :  { %v252_v45 = vadd.f32 %v381_v43, %v251_v44 }
  0xae   :  { %v257_v46 = vmax.f32 %v252_v45, 0.0 }
  0xb0   :  { %278 = vmatmul.f32.vlgmr.msra.gmra.mxu0 %v257_v46 }
  0xb3   :  { %v254_v47 = vpop.f32.mrf.mxu2 }
  0xb4   :  { %v255_v48 = vadd.f32 %v381_v43, %v254_v47 }
  0xb6   :  { %v258_v49 = vmax.f32 %v255_v48, 0.0 }
  0xb8   :  { %281 = vmatmul.f32.vlgmr.msra.gmra.mxu3 %v258_v49 }
 0x125   :  { %v200_v51 = vpop.f32.mrf.mxu1 }
 0x126   :  { %v201_v52 = vadd.f32 %v382_v50, %v200_v51 }
 0x128   :  { %v287_v55 = vperm.slane %v201_v52, 0  ;;  %v286_v59 = vrot.slane %v201_v52, 1 }
 0x12a   :  { %v288_v62 = vperm.slane %v286_v59, 0 }
 0x12d   :  { %v279_v54 = vpop.f32.mrf.mxu0 }
 0x12e   :  { %v280_v56 = vadd.f32 %v383_v53, %v279_v54 }
 0x130   :  { %v291_v57 = vmul.f32 %v287_v55, %v280_v56 }
 0x132   :  { %293 = vst [vmem:[#allocation13] sm:$0xff] %v291_v57  ;;  %v295_v58 = vrot.slane %v291_v57, 4 }
 0x134   :  { %v296_v60 = vmax.f32 %v291_v57, %v295_v58 }
 0x136   :  { %v297_v0 = vrot.slane %v296_v60, 2 }
 0x138   :  { %v298_v3 = vmax.f32 %v296_v60, %v297_v0 }
 0x13a   :  { %v299_v7 = vrot.slane %v298_v3, 1 }
 0x13b   :  { %v282_v61 = vpop.f32.mrf.mxu3 }
 0x13c   :  { %v283_v63 = vadd.f32 %v383_v53, %v282_v61  ;;  %v300_v9 = vmax.f32 %v298_v3, %v299_v7 }
 0x13e   :  { %v292_v1 = vmul.f32 %v288_v62, %v283_v63 }
 0x140   :  { %v301_v2 = vrot.slane %v292_v1, 4  ;;  %294 = vst [vmem:[#allocation13 + $0x8] sm:$0xff] %v292_v1 }
 0x141   :  { %325 = dma.vmem_to_hbm [thread:$0]  %s318_s13, 256, %s320_s9, [#allocation4], %s590_s1, %s590_s1, %s591_s30  }
 0x142   :  { %v302_v4 = vmax.f32 %v292_v1, %v301_v2 }
 0x144   :  { %v303_v5 = vrot.slane %v302_v4, 2 }
 0x146   :  { %v304_v6 = vmax.f32 %v302_v4, %v303_v5 }
 0x148   :  { %v305_v8 = vrot.slane %v304_v6, 1 }
 0x14a   :  { %v306_v10 = vmax.f32 %v304_v6, %v305_v8 }
 0x14c   :  { %v310_v11 = vsel %vm309_vm1, %v306_v10, %v300_v9 }
 0x14d   :  { %312 = vst [vmem:[#allocation14] sm:$0x3] %v310_v11 }
 0x14e   :  { %336 = dma.vmem_to_hbm [thread:$0]  %s332_s10, 32, %s334_s16, [#allocation15]  }
 0x14f   :  { %584 = dma.done.wait [#allocation4], 256  }
 0x150   :  { %585 = vsyncadd [#allocation4], 4294967040 }
 0x151   :  { %586 = dma.done.wait [#allocation15], 32  }
 0x152   :  { %587 = vsyncadd [#allocation15], 4294967264 }
 0x153   :  { %345 = vsyncpa [#allocation3], 1 }
 0x154   :  { %346 = vsyncpa [#allocation6], 1 }
 0x155   :  { %347 = vsyncpa [#allocation9], 1 }
 0x156   :  { %348 = vsyncpa [#allocation12], 1 }
 0x157   :  { %349 = vsyncpa [#allocation4], 1 }
 0x158   :  { %350 = vsyncpa [#allocation15], 1 }

</bundles_post_ra>
